<compile_context>
chip_gen: v5e
topology: v5e:2x2
jax: 0.10.0
libtpu: 0.0.40
codegen_flags: <defaults>
</compile_context>

<pallas_src>
import functools

import jax
import jax.numpy as jnp
from jax.experimental import pallas as pl
from jax.experimental.pallas import tpu as pltpu


def _round_up(n, m):
    return (n + m - 1) // m * m


def fcn_kernel(x_ref, w1_ref, b1_ref, w2_ref, b2_ref, w3_ref, b3_ref, o_ref):
    # fc1 + relu1: bf16 operands on the MXU, f32 accumulate, f32 bias/ReLU (VPU).
    h = jnp.dot(x_ref[...], w1_ref[...], preferred_element_type=jnp.float32)
    h = jnp.maximum(h + b1_ref[...], 0.0)
    # fc2 + relu2
    h = jnp.dot(h.astype(w2_ref.dtype), w2_ref[...],
                preferred_element_type=jnp.float32)
    h = jnp.maximum(h + b2_ref[...], 0.0)
    # fc3 (output head, no activation) -> lane-dense (TILE_B, C_pad) store.
    o = jnp.dot(h.astype(w3_ref.dtype), w3_ref[...],
                preferred_element_type=jnp.float32)
    o_ref[...] = (o + b3_ref[...]).astype(o_ref.dtype)


@functools.partial(jax.jit, static_argnames=("tile_b",))
def fcn_forward(x, params, *, tile_b=256):
    """x: (B, input_dim) f32; params: w1,b1,w2,b2,w3,b3 with weights as (in, out)."""
    w1, b1 = params["w1"], params["b1"]
    w2, b2 = params["w2"], params["b2"]
    w3, b3 = params["w3"], params["b3"]

    B, D = x.shape
    H = w1.shape[1]
    C = w3.shape[1]

    # Pad feature dims to lane multiples (128) and batch to the tile size.
    D_pad = _round_up(D, 128)
    H_pad = _round_up(H, 128)
    C_pad = _round_up(C, 128)
    TILE_B = min(tile_b, _round_up(B, 8))
    B_pad = _round_up(B, TILE_B)

    bf16 = jnp.bfloat16
    xp = jnp.zeros((B_pad, D_pad), bf16).at[:B, :D].set(x.astype(bf16))
    w1p = jnp.zeros((D_pad, H_pad), bf16).at[:D, :H].set(w1.astype(bf16))
    w2p = jnp.zeros((H_pad, H_pad), bf16).at[:H, :H].set(w2.astype(bf16))
    w3p = jnp.zeros((H_pad, C_pad), bf16).at[:H, :C].set(w3.astype(bf16))
    b1p = jnp.zeros((1, H_pad), jnp.float32).at[:, :H].set(b1)
    b2p = jnp.zeros((1, H_pad), jnp.float32).at[:, :H].set(b2)
    b3p = jnp.zeros((1, C_pad), jnp.float32).at[:, :C].set(b3)

    grid = (B_pad // TILE_B,)

    # VMEM budget: double-buffered x/out tiles + resident weights/biases
    # + f32 intermediates; capped at 48 MiB (safe on v7x's 64 MiB physical).
    vmem_bytes = (
        2 * TILE_B * D_pad * 2                       # x double-buffer (bf16)
        + 2 * TILE_B * C_pad * 4                     # out double-buffer (f32)
        + (D_pad * H_pad + H_pad * H_pad + H_pad * C_pad) * 2  # resident weights
        + (2 * H_pad + C_pad) * 4                    # resident biases
        + 4 * TILE_B * H_pad * 4                     # f32 intermediates headroom
    )
    vmem_limit = int(min(max(2 * vmem_bytes, 16 * 1024 * 1024), 48 * 1024 * 1024))

    flops = 2 * B_pad * (D_pad * H_pad + H_pad * H_pad + H_pad * C_pad)
    bytes_accessed = (
        B_pad * D_pad * 2 + B_pad * C_pad * 4
        + (D_pad * H_pad + H_pad * H_pad + H_pad * C_pad) * 2
        + (2 * H_pad + C_pad) * 4
    )

    out = pl.pallas_call(
        fcn_kernel,
        out_shape=jax.ShapeDtypeStruct((B_pad, C_pad), jnp.float32),
        grid=grid,
        in_specs=[
            pl.BlockSpec((TILE_B, D_pad), lambda i: (i, 0)),   # x: tiled over batch
            pl.BlockSpec((D_pad, H_pad), lambda i: (0, 0)),    # w1: VMEM-resident
            pl.BlockSpec((1, H_pad), lambda i: (0, 0)),        # b1
            pl.BlockSpec((H_pad, H_pad), lambda i: (0, 0)),    # w2
            pl.BlockSpec((1, H_pad), lambda i: (0, 0)),        # b2
            pl.BlockSpec((H_pad, C_pad), lambda i: (0, 0)),    # w3
            pl.BlockSpec((1, C_pad), lambda i: (0, 0)),        # b3
        ],
        out_specs=pl.BlockSpec((TILE_B, C_pad), lambda i: (i, 0)),
        compiler_params=pltpu.CompilerParams(
            dimension_semantics=("parallel",),
            vmem_limit_bytes=vmem_limit,
        ),
        cost_estimate=pl.CostEstimate(
            flops=flops, bytes_accessed=bytes_accessed, transcendentals=0
        ),
    )(xp, w1p, b1p, w2p, b2p, w3p, b3p)

    # Strip batch / class padding.
    return out[:B, :C]


def init_params(key, input_dim, hidden, num_classes):
    """Deterministic PyTorch-style (Kaiming-uniform-ish) init; weights as (in, out)."""
    ks = jax.random.split(key, 6)

    def linear(kw, kb, fan_in, fan_out):
        bound = 1.0 / jnp.sqrt(jnp.float32(fan_in))
        w = jax.random.uniform(kw, (fan_in, fan_out), jnp.float32, -bound, bound)
        b = jax.random.uniform(kb, (1, fan_out), jnp.float32, -bound, bound)
        return w, b

    w1, b1 = linear(ks[0], ks[1], input_dim, hidden)
    w2, b2 = linear(ks[2], ks[3], hidden, hidden)
    w3, b3 = linear(ks[4], ks[5], hidden, num_classes)
    return {"w1": w1, "b1": b1, "w2": w2, "b2": b2, "w3": w3, "b3": b3}


def fcn_reference(x, p):
    """Reference with the same bf16 operand rounding the kernel uses (f32 accumulate)."""
    def mm(a, w):
        return jax.lax.dot(
            a.astype(jnp.bfloat16).astype(jnp.float32),
            w.astype(jnp.bfloat16).astype(jnp.float32),
            precision=jax.lax.Precision.HIGHEST,
        )

    h = jnp.maximum(mm(x, p["w1"]) + p["b1"], 0.0)
    h = jnp.maximum(mm(h, p["w2"]) + p["b2"], 0.0)
    return mm(h, p["w3"]) + p["b3"]


if __name__ == "__main__":
    # Small shapes consistent with the module defaults
    # (num_hidden_layers=2, hidden_layer_width=40, num_classes=1).
    batch = 8
    input_dim = 128   # small stand-in for 28*28
    hidden = 40
    num_classes = 1

    key = jax.random.PRNGKey(0)
    kx, kp = jax.random.split(key)
    x = jax.random.normal(kx, (batch, input_dim), jnp.float32)
    params = init_params(kp, input_dim, hidden, num_classes)

    out = fcn_forward(x, params)
    out = jax.block_until_ready(out)

    ref = fcn_reference(x, params)
    assert out.shape == (batch, num_classes), out.shape
    assert jnp.allclose(out, ref, atol=2e-2, rtol=2e-2), "mismatch vs JAX reference"

    print("KERNEL_OK")
</pallas_src>

<mosaic_0001>
module attributes {stable_mosaic.version = 11 : i64} {
  func.func @fcn_kernel(%arg0: i32, %arg1: memref<8x128xbf16, #tpu.memory_space<vmem>>, %arg2: memref<128x128xbf16, #tpu.memory_space<vmem>>, %arg3: memref<1x128xf32, #tpu.memory_space<vmem>>, %arg4: memref<128x128xbf16, #tpu.memory_space<vmem>>, %arg5: memref<1x128xf32, #tpu.memory_space<vmem>>, %arg6: memref<128x128xbf16, #tpu.memory_space<vmem>>, %arg7: memref<1x128xf32, #tpu.memory_space<vmem>>, %arg8: memref<8x128xf32, #tpu.memory_space<vmem>>) attributes {dimension_semantics = [#tpu.dimension_semantics<parallel>], iteration_bounds = array<i64: 1>, scalar_prefetch = 0 : i64, scratch_operands = 0 : i64, tpu.core_type = #tpu.core_type<tc>, window_params = [{transform_indices = @transform_0, window_bounds = array<i64: 8, 128>}, {pipeline_mode = #tpu.pipeline_mode<synchronous>, transform_indices = @transform_1, window_bounds = array<i64: 128, 128>}, {pipeline_mode = #tpu.pipeline_mode<synchronous>, transform_indices = @transform_2, window_bounds = array<i64: 1, 128>}, {pipeline_mode = #tpu.pipeline_mode<synchronous>, transform_indices = @transform_3, window_bounds = array<i64: 128, 128>}, {pipeline_mode = #tpu.pipeline_mode<synchronous>, transform_indices = @transform_4, window_bounds = array<i64: 1, 128>}, {pipeline_mode = #tpu.pipeline_mode<synchronous>, transform_indices = @transform_5, window_bounds = array<i64: 128, 128>}, {pipeline_mode = #tpu.pipeline_mode<synchronous>, transform_indices = @transform_6, window_bounds = array<i64: 1, 128>}, {transform_indices = @transform_7, window_bounds = array<i64: 8, 128>}]} {
    %c0 = arith.constant 0 : index
    %c0_0 = arith.constant 0 : index
    %0 = vector.load %arg1[%c0, %c0_0] : memref<8x128xbf16, #tpu.memory_space<vmem>>, vector<8x128xbf16>
    %c0_1 = arith.constant 0 : index
    %c0_2 = arith.constant 0 : index
    %1 = vector.load %arg2[%c0_1, %c0_2] : memref<128x128xbf16, #tpu.memory_space<vmem>>, vector<128x128xbf16>
    %cst = arith.constant dense<0.000000e+00> : vector<8x128xf32>
    %2 = tpu.matmul %0, %1, %cst {dimension_numbers = #tpu.dot_dimension_numbers<[1], [0], [0], [1], [0, 0, 1, 1], [], []>} : vector<8x128xbf16>, vector<128x128xbf16>, vector<8x128xf32> -> vector<8x128xf32>
    %c0_3 = arith.constant 0 : index
    %c0_4 = arith.constant 0 : index
    %3 = vector.load %arg3[%c0_3, %c0_4] : memref<1x128xf32, #tpu.memory_space<vmem>>, vector<1x128xf32>
    %4 = vector.broadcast %3 : vector<1x128xf32> to vector<8x128xf32>
    %5 = arith.addf %2, %4 : vector<8x128xf32>
    %cst_5 = arith.constant 0.000000e+00 : f32
    %6 = vector.broadcast %cst_5 : f32 to vector<8x128xf32>
    %7 = arith.maximumf %5, %6 : vector<8x128xf32>
    %8 = arith.truncf %7 : vector<8x128xf32> to vector<8x128xbf16>
    %c0_6 = arith.constant 0 : index
    %c0_7 = arith.constant 0 : index
    %9 = vector.load %arg4[%c0_6, %c0_7] : memref<128x128xbf16, #tpu.memory_space<vmem>>, vector<128x128xbf16>
    %cst_8 = arith.constant dense<0.000000e+00> : vector<8x128xf32>
    %10 = tpu.matmul %8, %9, %cst_8 {dimension_numbers = #tpu.dot_dimension_numbers<[1], [0], [0], [1], [0, 0, 1, 1], [], []>} : vector<8x128xbf16>, vector<128x128xbf16>, vector<8x128xf32> -> vector<8x128xf32>
    %c0_9 = arith.constant 0 : index
    %c0_10 = arith.constant 0 : index
    %11 = vector.load %arg5[%c0_9, %c0_10] : memref<1x128xf32, #tpu.memory_space<vmem>>, vector<1x128xf32>
    %12 = vector.broadcast %11 : vector<1x128xf32> to vector<8x128xf32>
    %13 = arith.addf %10, %12 : vector<8x128xf32>
    %cst_11 = arith.constant 0.000000e+00 : f32
    %14 = vector.broadcast %cst_11 : f32 to vector<8x128xf32>
    %15 = arith.maximumf %13, %14 : vector<8x128xf32>
    %16 = arith.truncf %15 : vector<8x128xf32> to vector<8x128xbf16>
    %c0_12 = arith.constant 0 : index
    %c0_13 = arith.constant 0 : index
    %17 = vector.load %arg6[%c0_12, %c0_13] : memref<128x128xbf16, #tpu.memory_space<vmem>>, vector<128x128xbf16>
    %cst_14 = arith.constant dense<0.000000e+00> : vector<8x128xf32>
    %18 = tpu.matmul %16, %17, %cst_14 {dimension_numbers = #tpu.dot_dimension_numbers<[1], [0], [0], [1], [0, 0, 1, 1], [], []>} : vector<8x128xbf16>, vector<128x128xbf16>, vector<8x128xf32> -> vector<8x128xf32>
    %c0_15 = arith.constant 0 : index
    %c0_16 = arith.constant 0 : index
    %19 = vector.load %arg7[%c0_15, %c0_16] : memref<1x128xf32, #tpu.memory_space<vmem>>, vector<1x128xf32>
    %20 = vector.broadcast %19 : vector<1x128xf32> to vector<8x128xf32>
    %21 = arith.addf %18, %20 : vector<8x128xf32>
    %c0_17 = arith.constant 0 : index
    %c0_18 = arith.constant 0 : index
    %22 = vector.load %arg8[%c0_17, %c0_18] : memref<8x128xf32, #tpu.memory_space<vmem>>, vector<8x128xf32>
    tpu.vector_store %arg8[%c0_17, %c0_18], %21 {strides = array<i32>} : memref<8x128xf32, #tpu.memory_space<vmem>>, vector<8x128xf32>,
    return
  }
  func.func @transform_0(%arg0: i32) -> (i32, i32) {
    %c0_i32 = arith.constant 0 : i32
    %c0_i32_0 = arith.constant 0 : i32
    return %arg0, %c0_i32 : i32, i32
  }
  func.func @transform_1(%arg0: i32) -> (i32, i32) {
    %c0_i32 = arith.constant 0 : i32
    %c0_i32_0 = arith.constant 0 : i32
    %c0_i32_1 = arith.constant 0 : i32
    return %c0_i32, %c0_i32_0 : i32, i32
  }
  func.func @transform_2(%arg0: i32) -> (i32, i32) {
    %c0_i32 = arith.constant 0 : i32
    %c0_i32_0 = arith.constant 0 : i32
    %c0_i32_1 = arith.constant 0 : i32
    return %c0_i32, %c0_i32_0 : i32, i32
  }
  func.func @transform_3(%arg0: i32) -> (i32, i32) {
    %c0_i32 = arith.constant 0 : i32
    %c0_i32_0 = arith.constant 0 : i32
    %c0_i32_1 = arith.constant 0 : i32
    return %c0_i32, %c0_i32_0 : i32, i32
  }
  func.func @transform_4(%arg0: i32) -> (i32, i32) {
    %c0_i32 = arith.constant 0 : i32
    %c0_i32_0 = arith.constant 0 : i32
    %c0_i32_1 = arith.constant 0 : i32
    return %c0_i32, %c0_i32_0 : i32, i32
  }
  func.func @transform_5(%arg0: i32) -> (i32, i32) {
    %c0_i32 = arith.constant 0 : i32
    %c0_i32_0 = arith.constant 0 : i32
    %c0_i32_1 = arith.constant 0 : i32
    return %c0_i32, %c0_i32_0 : i32, i32
  }
  func.func @transform_6(%arg0: i32) -> (i32, i32) {
    %c0_i32 = arith.constant 0 : i32
    %c0_i32_0 = arith.constant 0 : i32
    %c0_i32_1 = arith.constant 0 : i32
    return %c0_i32, %c0_i32_0 : i32, i32
  }
  func.func @transform_7(%arg0: i32) -> (i32, i32) {
    %c0_i32 = arith.constant 0 : i32
    %c0_i32_0 = arith.constant 0 : i32
    return %arg0, %c0_i32 : i32, i32
  }
}

</mosaic_0001>

<bundles_post_ra>
// kernel: fcn_forward.1
= control target key start
LH: loop header
LB: loop body
LE: loop exit
PB: predicated region body
PF: predicated region fallthrough
CT: control target
= control target key end

     0   :  { %s529_s1 = inlined_call_operand.vmem [shape: bf16[128,128], index: 1, kind: input, shape index: {}]   ;;  %s530_s3 = inlined_call_operand.vmem [shape: bf16[128,128], index: 3, kind: input, shape index: {}]   ;;  %s531_s2 = inlined_call_operand.vmem [shape: f32[1,128], index: 2, kind: input, shape index: {}]   ;;  %s532_s0 = inlined_call_operand.vmem [shape: bf16[8,128], index: 0, kind: input, shape index: {}]   ;;  %s533_s4 = inlined_call_operand.vmem [shape: f32[1,128], index: 4, kind: input, shape index: {}]   ;;  %s534_s5 = inlined_call_operand.vmem [shape: bf16[128,128], index: 5, kind: input, shape index: {}]   ;;  %s535_s6 = inlined_call_operand.vmem [shape: f32[1,128], index: 6, kind: input, shape index: {}]   ;;  %s536_s7 = inlined_call_operand.vmem [shape: f32[8,128], index: 7, kind: output, shape index: {}]  }
   0x1   :  { %v382_v0 = vld [vmem:[%s529_s1 + $0x38] sm:$0xff]  ;;  %v381_v1 = vld [vmem:[%s529_s1 + $0x30] sm:$0xff]  ;;  %v380_v4 = vld [vmem:[%s529_s1 + $0x28] sm:$0xff] }
   0x2   :  { %95 = vmatpush.bf16.msra.mxu0 %v382_v0  ;;  %v390_v2 = vld [vmem:[%s530_s3 + $0x38] sm:$0xff]  ;;  %v389_v3 = vld [vmem:[%s530_s3 + $0x30] sm:$0xff]  ;;  %v388_v5 = vld [vmem:[%s530_s3 + $0x28] sm:$0xff] }
   0x3   :  { %178 = vmatpush.bf16.msra.mxu1 %v390_v2  ;;  %v379_v6 = vld [vmem:[%s529_s1 + $0x20] sm:$0xff]  ;;  %v378_v8 = vld [vmem:[%s529_s1 + $0x18] sm:$0xff]  ;;  %v377_v10 = vld [vmem:[%s529_s1 + $0x10] sm:$0xff] }
   0x4   :  { %v387_v7 = vld [vmem:[%s530_s3 + $0x20] sm:$0xff]  ;;  %v386_v9 = vld [vmem:[%s530_s3 + $0x18] sm:$0xff]  ;;  %v385_v11 = vld [vmem:[%s530_s3 + $0x10] sm:$0xff] }
   0x5   :  { %v376_v12 = vld [vmem:[%s529_s1 + $0x8] sm:$0xff]  ;;  %v375_v13 = vld [vmem:[%s529_s1] sm:$0xff]  ;;  %v398_v17 = vld [vmem:[%s534_s5 + $0x38] sm:$0xff] }
   0x6   :  { %96 = vmatpush.bf16.msra.mxu0 %v381_v1  ;;  %v26_v14 = vld [vmem:[%s532_s0] sm:$0xf]  ;;  %v384_v15 = vld [vmem:[%s530_s3 + $0x8] sm:$0xff]  ;;  %261 = vmatpush.bf16.msra.mxu2 %v398_v17  ;;  %v397_v18 = vld [vmem:[%s534_s5 + $0x30] sm:$0xff] }
   0x7   :  { %179 = vmatpush.bf16.msra.mxu1 %v389_v3  ;;  %v383_v16 = vld [vmem:[%s530_s3] sm:$0xff]  ;;  %v396_v19 = vld [vmem:[%s534_s5 + $0x28] sm:$0xff]  ;;  %v394_v21 = vld [vmem:[%s534_s5 + $0x18] sm:$0xff] }
   0x8   :  { %v395_v20 = vld [vmem:[%s534_s5 + $0x20] sm:$0xff]  ;;  %v393_v22 = vld [vmem:[%s534_s5 + $0x10] sm:$0xff]  ;;  %v392_v29 = vld [vmem:[%s534_s5 + $0x8] sm:$0xff] }
   0x9   :  { %v399_v23 = vld [vmem:[%s531_s2] ss:$0 sm:$0xff] }
   0xa   :  { %97 = vmatpush.bf16.msra.mxu0 %v380_v4  ;;  %262 = vmatpush.bf16.msra.mxu2 %v397_v18  ;;  %v391_v30 = vld [vmem:[%s534_s5] sm:$0xff] }
   0xb   :  { %180 = vmatpush.bf16.msra.mxu1 %v388_v5  ;;  %v400_v31 = vld [vmem:[%s533_s4] ss:$0 sm:$0xff] }
   0xc   :  { %v401_v37 = vld [vmem:[%s535_s6] ss:$0 sm:$0xff] }
   0xe   :  { %98 = vmatpush.bf16.msra.mxu0 %v379_v6  ;;  %263 = vmatpush.bf16.msra.mxu2 %v396_v19 }
   0xf   :  { %181 = vmatpush.bf16.msra.mxu1 %v387_v7 }
  0x12   :  { %99 = vmatpush.bf16.msra.mxu0 %v378_v8  ;;  %264 = vmatpush.bf16.msra.mxu2 %v395_v20 }
  0x13   :  { %182 = vmatpush.bf16.msra.mxu1 %v386_v9 }
  0x16   :  { %100 = vmatpush.bf16.msra.mxu0 %v377_v10  ;;  %265 = vmatpush.bf16.msra.mxu2 %v394_v21 }
  0x17   :  { %183 = vmatpush.bf16.msra.mxu1 %v385_v11 }
  0x1a   :  { %101 = vmatpush.bf16.msra.mxu0 %v376_v12  ;;  %266 = vmatpush.bf16.msra.mxu2 %v393_v22 }
  0x1b   :  { %184 = vmatpush.bf16.msra.mxu1 %v384_v15 }
  0x1e   :  { %102 = vmatpush.bf16.msra.mxu0 %v375_v13  ;;  %267 = vmatpush.bf16.msra.mxu2 %v392_v29 }
  0x1f   :  { %185 = vmatpush.bf16.msra.mxu1 %v383_v16 }
  0x21   :  { %103 = vmatmul.bf16.vlgmr.msra.gmra.mxu0 %v26_v14 }
  0x22   :  { %268 = vmatpush.bf16.msra.mxu2 %v391_v30 }
  0x9e   :  { %v104_v24 = vpop.f32.mrf.mxu0 }
  0x9f   :  { %v105_v25 = vadd.f32 %v399_v23, %v104_v24 }
  0xa1   :  { %v108_v26 = vmax.f32 %v105_v25, 0.0 }
  0xa3   :  { %v109_v27 = vpack.c.bf16 %v108_v26, %v108_v26 }
  0xa5   :  { %186 = vmatmul.bf16.vlgmr.msra.gmra.mxu1 %v109_v27 }
  0xa6   :  { %v106_v28 = vpop.f32.mrf.mxu0 }
 0x122   :  { %v187_v32 = vpop.f32.mrf.mxu1 }
 0x123   :  { %v188_v33 = vadd.f32 %v400_v31, %v187_v32 }
 0x125   :  { %v191_v34 = vmax.f32 %v188_v33, 0.0 }
 0x127   :  { %v192_v35 = vpack.c.bf16 %v191_v34, %v191_v34 }
 0x129   :  { %269 = vmatmul.bf16.vlgmr.msra.gmra.mxu2 %v192_v35 }
 0x12a   :  { %v189_v36 = vpop.f32.mrf.mxu1 }
 0x1ac   :  { %v270_v38 = vpop.f32.mrf.mxu2 }
 0x1ad   :  { %v271_v39 = vadd.f32 %v401_v37, %v270_v38 }
 0x1af   :  { %274 = vst [vmem:[%s536_s7] sm:$0xff] %v271_v39 }
 0x1b4   :  { %v272_v40 = vpop.f32.mrf.mxu2 }

</bundles_post_ra>
